<compile_context>
chip_gen: v5e
topology: v5e:2x2
jax: 0.10.0
libtpu: 0.0.40
codegen_flags: <defaults>
</compile_context>

<pallas_src>
import functools

import jax
import jax.numpy as jnp
from jax.experimental import pallas as pl
from jax.experimental.pallas import tpu as pltpu

FEATURE_DIM = 384
NUM_CLASSES = 4
BN_EPS = 1e-6


def _head_kernel(feat_ref, w_ref, b_ref, out_ref, acc_ref, *, n_tokens, n_avg_tokens):
    """feat_ref: [B, TN, D] token tile; w_ref: [D, Cpad]; b_ref: [1, Cpad];
    out_ref: [B, Cpad]; acc_ref: VMEM [B, D] f32 pooled-sum accumulator."""
    t = pl.program_id(0)

    @pl.when(t == 0)
    def _():
        acc_ref[...] = jnp.zeros_like(acc_ref)

    tn = feat_ref.shape[1]
    # Global token index of each row in this tile.  keep selects tokens
    # 1 .. n_tokens-1: drops the CLS token (index 0) and any ragged-tail rows
    # past the true sequence length, so no wrapper-side padding is needed.
    tok_idx = t * tn + jax.lax.broadcasted_iota(jnp.int32, (1, tn, 1), 1)
    keep = jnp.logical_and(tok_idx >= 1, tok_idx < n_tokens)
    tile = jnp.where(keep, feat_ref[...], 0).astype(jnp.float32)     # mask in src dtype
    acc_ref[...] += jnp.sum(tile, axis=1)                            # [B, D] running sum

    @pl.when(t == pl.num_programs(0) - 1)
    def _():
        pooled = acc_ref[...] * (1.0 / float(n_avg_tokens))          # [B, D]

        # BatchNorm1d(affine=False, eps=1e-6), training-mode batch statistics
        # (biased variance, as PyTorch uses for normalization).
        bmean = jnp.mean(pooled, axis=0, keepdims=True)              # [1, D]
        centered = pooled - bmean
        bvar = jnp.mean(centered * centered, axis=0, keepdims=True)
        xhat = centered * jax.lax.rsqrt(bvar + BN_EPS)               # [B, D]

        # Linear(D -> Cpad) on the MXU; lane-dense (Cpad multiple of 128) store.
        out = jnp.dot(xhat, w_ref[...].astype(jnp.float32),
                      preferred_element_type=jnp.float32)
        out_ref[...] = out + b_ref[...].astype(jnp.float32)          # broadcast [1, Cpad]


def _round_up(x, m):
    return ((x + m - 1) // m) * m


def _vmem_limit_bytes():
    """Generation-aware scoped-VMEM budget (~75% of physical VMEM per core)."""
    try:
        physical = int(pltpu.get_tpu_info().vmem_capacity_bytes)
    except Exception:
        physical = 64 << 20                      # conservative (v7x-sized) fallback
    return max(16 << 20, min(int(physical * 0.75), 100 << 20))


def mae_classification_head(features, weight, bias, *, token_tile=None):
    """features: [B, N, D] (CLS at token 0); weight: [D, C]; bias: [C].

    Returns [B, C] float32.  `token_tile` optionally caps the token-axis tile;
    by default the tile is sized from the VMEM budget of the current chip.
    """
    B, N, D = features.shape
    C = weight.shape[1]
    assert N >= 2, "need at least one non-CLS token for 'avg' pooling"

    # Lane-dense classifier: pad the class dim up to a multiple of 128.
    c_pad = _round_up(C, 128)
    w_pad = jnp.zeros((D, c_pad), weight.dtype).at[:, :C].set(weight)
    b_pad = jnp.zeros((1, c_pad), bias.dtype).at[0, :C].set(bias)

    feat_itemsize = jnp.dtype(features.dtype).itemsize
    # Dtype-aware sublane multiple for the second-to-last block dim.
    sublane = {4: 8, 2: 16, 1: 32}.get(feat_itemsize, 8)

    # VMEM-budget- and batch-aware token tile: largest tn such that the
    # double-buffered (B, tn, D) feature tile plus the resident weight / bias /
    # output block / accumulator fits the scoped budget, with headroom.
    vmem_limit = _vmem_limit_bytes()
    resident = (D * c_pad * jnp.dtype(w_pad.dtype).itemsize
                + c_pad * jnp.dtype(b_pad.dtype).itemsize
                + B * c_pad * 4                  # output block (f32)
                + B * D * 4)                     # pooled-sum accumulator (f32)
    headroom = vmem_limit - 2 * resident - (2 << 20)    # Mosaic internal-scratch margin
    bytes_per_token_row = 2 * B * D * feat_itemsize     # double-buffered input tile
    max_tn = max(sublane, (headroom // bytes_per_token_row) // sublane * sublane)

    tn = min(max_tn, _round_up(N, sublane))
    if token_tile is not None:
        tn = min(tn, _round_up(int(token_tile), sublane))
    tn = max(sublane, (tn // sublane) * sublane)

    # Ragged tail handled by in-kernel masking -> no jnp.pad copy of features.
    grid = (pl.cdiv(N, tn),)

    cost = pl.CostEstimate(
        flops=3 * B * N * D + 2 * B * D * c_pad + 6 * B * D,
        transcendentals=D,                       # rsqrt over the feature dim
        bytes_accessed=(B * N * D * feat_itemsize
                        + D * c_pad * jnp.dtype(w_pad.dtype).itemsize
                        + B * c_pad * 4),
    )

    kernel = functools.partial(_head_kernel, n_tokens=N, n_avg_tokens=N - 1)

    out = pl.pallas_call(
        kernel,
        out_shape=jax.ShapeDtypeStruct((B, c_pad), jnp.float32),
        grid_spec=pltpu.PrefetchScalarGridSpec(
            num_scalar_prefetch=0,
            grid=grid,
            in_specs=[
                pl.BlockSpec((B, tn, D), lambda t: (0, t, 0)),   # streamed token tiles
                pl.BlockSpec((D, c_pad), lambda t: (0, 0)),      # resident weight
                pl.BlockSpec((1, c_pad), lambda t: (0, 0)),      # resident bias
            ],
            out_specs=pl.BlockSpec((B, c_pad), lambda t: (0, 0)),
            scratch_shapes=[pltpu.VMEM((B, D), jnp.float32)],    # pooled-sum acc
        ),
        compiler_params=pltpu.CompilerParams(
            dimension_semantics=("arbitrary",),   # token axis is a reduction
            vmem_limit_bytes=vmem_limit,
        ),
        cost_estimate=cost,
    )(features, w_pad, b_pad)
    return out[:, :C]


# ---------------------------------------------------------------------------
# Stand-in backbone (plain JAX glue): deterministic patch-embed + CLS token.
# ---------------------------------------------------------------------------
def standin_forward_encoder(x_nchw, patch_w, cls_token, patch=4):
    B, C, H, W = x_nchw.shape
    ph, pw = H // patch, W // patch
    xp = x_nchw.reshape(B, C, ph, patch, pw, patch)
    xp = jnp.transpose(xp, (0, 2, 4, 1, 3, 5)).reshape(B, ph * pw, C * patch * patch)
    tokens = xp @ patch_w                                    # [B, ph*pw, D]
    cls = jnp.broadcast_to(cls_token, (B, 1, FEATURE_DIM))
    return jnp.concatenate([cls, tokens], axis=1)            # [B, ph*pw + 1, D]


def reference_head(features, weight, bias):
    pooled = jnp.mean(features[:, 1:, :], axis=1)
    bmean = jnp.mean(pooled, axis=0, keepdims=True)
    bvar = jnp.mean((pooled - bmean) ** 2, axis=0, keepdims=True)
    xhat = (pooled - bmean) / jnp.sqrt(bvar + BN_EPS)
    return xhat @ weight + bias


if __name__ == "__main__":
    key = jax.random.PRNGKey(0)
    k_x, k_pw, k_cls, k_w, k_b = jax.random.split(key, 5)

    # Small NCHW image input consistent with the module.
    B, Cin, H, W = 8, 4, 16, 16
    patch = 4                                   # 16 patch tokens + 1 CLS = 17 tokens
    x = jax.random.normal(k_x, (B, Cin, H, W), dtype=jnp.float32)

    patch_w = jax.random.normal(k_pw, (Cin * patch * patch, FEATURE_DIM),
                                dtype=jnp.float32) * 0.02
    cls_token = jax.random.normal(k_cls, (1, 1, FEATURE_DIM),
                                  dtype=jnp.float32) * 0.02
    lin_w = jax.random.normal(k_w, (FEATURE_DIM, NUM_CLASSES),
                              dtype=jnp.float32) * (1.0 / jnp.sqrt(FEATURE_DIM))
    lin_b = jax.random.normal(k_b, (NUM_CLASSES,), dtype=jnp.float32) * 0.01

    # "backbone.forward_encoder" -> features [B, 17, 384], CLS at index 0.
    features = standin_forward_encoder(x, patch_w, cls_token, patch=patch)

    # token_tile=8 at these tiny shapes exercises the multi-step, in-kernel
    # masked reduction (grid of 3 over 17 tokens; last tile is ragged).
    out = mae_classification_head(features, lin_w, lin_b, token_tile=8)
    out = jax.block_until_ready(out)

    ref = reference_head(features, lin_w, lin_b)
    assert out.shape == (B, NUM_CLASSES)
    assert jnp.allclose(out, ref, atol=1e-4, rtol=1e-4)

    # Default (VMEM-derived) tile: single-step path with whole sequence resident.
    out_full = mae_classification_head(features, lin_w, lin_b)
    out_full = jax.block_until_ready(out_full)
    assert jnp.allclose(out_full, ref, atol=1e-4, rtol=1e-4)

    print("KERNEL_OK")
</pallas_src>

<mosaic_0001>
module attributes {stable_mosaic.version = 11 : i64} {
  func.func @_head_kernel(%arg0: i32, %arg1: memref<8x8x384xf32, #tpu.memory_space<vmem>>, %arg2: memref<384x128xf32, #tpu.memory_space<vmem>>, %arg3: memref<1x128xf32, #tpu.memory_space<vmem>>, %arg4: memref<8x128xf32, #tpu.memory_space<vmem>>, %arg5: memref<8x384xf32, #tpu.memory_space<vmem>>) attributes {dimension_semantics = [#tpu.dimension_semantics<arbitrary>], iteration_bounds = array<i64: 3>, scalar_prefetch = 0 : i64, scratch_operands = 1 : i64, tpu.core_type = #tpu.core_type<tc>, window_params = [{transform_indices = @transform_0, window_bounds = array<i64: 8, 8, 384>}, {pipeline_mode = #tpu.pipeline_mode<synchronous>, transform_indices = @transform_1, window_bounds = array<i64: 384, 128>}, {pipeline_mode = #tpu.pipeline_mode<synchronous>, transform_indices = @transform_2, window_bounds = array<i64: 1, 128>}, {pipeline_mode = #tpu.pipeline_mode<synchronous>, transform_indices = @transform_3, window_bounds = array<i64: 8, 128>}]} {
    %c0_i32 = arith.constant 0 : i32
    %0 = arith.cmpi eq, %arg0, %c0_i32 : i32
    %1 = arith.extui %0 : i1 to i32
    %c0_i32_0 = arith.constant 0 : i32
    %2 = arith.cmpi ne, %1, %c0_i32_0 : i32
    scf.if %2 {
      %cst_9 = arith.constant 0.000000e+00 : f32
      %25 = vector.broadcast %cst_9 : f32 to vector<8x384xf32>
      %c0_10 = arith.constant 0 : index
      %c0_11 = arith.constant 0 : index
      %26 = vector.load %arg5[%c0_10, %c0_11] : memref<8x384xf32, #tpu.memory_space<vmem>>, vector<8x384xf32>
      tpu.vector_store %arg5[%c0_10, %c0_11], %25 {strides = array<i32>} : memref<8x384xf32, #tpu.memory_space<vmem>>, vector<8x384xf32>,
    } else {
    }
    %c8_i32 = arith.constant 8 : i32
    %3 = arith.muli %arg0, %c8_i32 : i32
    %4 = tpu.iota {dimensions = array<i32: 1>} : vector<1x8x1xi32>
    %5 = vector.broadcast %3 : i32 to vector<1x8x1xi32>
    %6 = arith.addi %5, %4 : vector<1x8x1xi32>
    %c1_i32 = arith.constant 1 : i32
    %7 = vector.broadcast %c1_i32 : i32 to vector<1x8x1xi32>
    %8 = arith.cmpi sge, %6, %7 : vector<1x8x1xi32>
    %c17_i32 = arith.constant 17 : i32
    %9 = vector.broadcast %c17_i32 : i32 to vector<1x8x1xi32>
    %10 = arith.cmpi slt, %6, %9 : vector<1x8x1xi32>
    %11 = arith.andi %8, %10 : vector<1x8x1xi1>
    %c0 = arith.constant 0 : index
    %c0_1 = arith.constant 0 : index
    %c0_2 = arith.constant 0 : index
    %12 = vector.load %arg1[%c0, %c0_1, %c0_2] : memref<8x8x384xf32, #tpu.memory_space<vmem>>, vector<8x8x384xf32>
    %c0_i32_3 = arith.constant 0 : i32
    %13 = arith.sitofp %c0_i32_3 : i32 to f32
    %14 = vector.shape_cast %11 : vector<1x8x1xi1> to vector<1x8x1xi1>
    %15 = vector.broadcast %14 : vector<1x8x1xi1> to vector<8x8x384xi1>
    %16 = vector.broadcast %13 : f32 to vector<8x8x384xf32>
    %17 = arith.select %15, %12, %16 : vector<8x8x384xi1>, vector<8x8x384xf32>
    %c0_4 = arith.constant 0 : index
    %c0_5 = arith.constant 0 : index
    %18 = vector.load %arg5[%c0_4, %c0_5] : memref<8x384xf32, #tpu.memory_space<vmem>>, vector<8x384xf32>
    %cst = arith.constant dense<0.000000e+00> : vector<8x384xf32>
    %19 = vector.multi_reduction <add>, %17, %cst [1] : vector<8x8x384xf32> to vector<8x384xf32>
    %20 = arith.addf %18, %19 : vector<8x384xf32>
    %c0_6 = arith.constant 0 : index
    %c0_7 = arith.constant 0 : index
    %21 = vector.load %arg5[%c0_6, %c0_7] : memref<8x384xf32, #tpu.memory_space<vmem>>, vector<8x384xf32>
    tpu.vector_store %arg5[%c0_6, %c0_7], %20 {strides = array<i32>} : memref<8x384xf32, #tpu.memory_space<vmem>>, vector<8x384xf32>,
    %c2_i32 = arith.constant 2 : i32
    %22 = arith.cmpi eq, %arg0, %c2_i32 : i32
    %23 = arith.extui %22 : i1 to i32
    %c0_i32_8 = arith.constant 0 : i32
    %24 = arith.cmpi ne, %23, %c0_i32_8 : i32
    scf.if %24 {
      %c0_9 = arith.constant 0 : index
      %c0_10 = arith.constant 0 : index
      %25 = vector.load %arg5[%c0_9, %c0_10] : memref<8x384xf32, #tpu.memory_space<vmem>>, vector<8x384xf32>
      %cst_11 = arith.constant 6.250000e-02 : f32
      %26 = vector.broadcast %cst_11 : f32 to vector<8x384xf32>
      %27 = arith.mulf %25, %26 : vector<8x384xf32>
      %cst_12 = arith.constant dense<0.000000e+00> : vector<384xf32>
      %28 = vector.multi_reduction <add>, %27, %cst_12 [0] : vector<8x384xf32> to vector<384xf32>
      %29 = vector.shape_cast %28 : vector<384xf32> to vector<1x384xf32>
      %cst_13 = arith.constant 8.000000e+00 : f32
      %30 = vector.broadcast %cst_13 : f32 to vector<1x384xf32>
      %31 = arith.divf %29, %30 : vector<1x384xf32>
      %32 = vector.broadcast %31 : vector<1x384xf32> to vector<8x384xf32>
      %33 = arith.subf %27, %32 : vector<8x384xf32>
      %34 = arith.mulf %33, %33 : vector<8x384xf32>
      %cst_14 = arith.constant dense<0.000000e+00> : vector<384xf32>
      %35 = vector.multi_reduction <add>, %34, %cst_14 [0] : vector<8x384xf32> to vector<384xf32>
      %36 = vector.shape_cast %35 : vector<384xf32> to vector<1x384xf32>
      %cst_15 = arith.constant 8.000000e+00 : f32
      %37 = vector.broadcast %cst_15 : f32 to vector<1x384xf32>
      %38 = arith.divf %36, %37 : vector<1x384xf32>
      %cst_16 = arith.constant 9.99999997E-7 : f32
      %39 = vector.broadcast %cst_16 : f32 to vector<1x384xf32>
      %40 = arith.addf %38, %39 : vector<1x384xf32>
      %41 = math.rsqrt %40 : vector<1x384xf32>
      %42 = vector.broadcast %41 : vector<1x384xf32> to vector<8x384xf32>
      %43 = arith.mulf %33, %42 : vector<8x384xf32>
      %c0_17 = arith.constant 0 : index
      %c0_18 = arith.constant 0 : index
      %44 = vector.load %arg2[%c0_17, %c0_18] : memref<384x128xf32, #tpu.memory_space<vmem>>, vector<384x128xf32>
      %cst_19 = arith.constant dense<0.000000e+00> : vector<8x128xf32>
      %45 = tpu.matmul %43, %44, %cst_19 {dimension_numbers = #tpu.dot_dimension_numbers<[1], [0], [0], [1], [0, 0, 1, 1], [], []>} : vector<8x384xf32>, vector<384x128xf32>, vector<8x128xf32> -> vector<8x128xf32>
      %c0_20 = arith.constant 0 : index
      %c0_21 = arith.constant 0 : index
      %46 = vector.load %arg3[%c0_20, %c0_21] : memref<1x128xf32, #tpu.memory_space<vmem>>, vector<1x128xf32>
      %47 = vector.broadcast %46 : vector<1x128xf32> to vector<8x128xf32>
      %48 = arith.addf %45, %47 : vector<8x128xf32>
      %c0_22 = arith.constant 0 : index
      %c0_23 = arith.constant 0 : index
      %49 = vector.load %arg4[%c0_22, %c0_23] : memref<8x128xf32, #tpu.memory_space<vmem>>, vector<8x128xf32>
      tpu.vector_store %arg4[%c0_22, %c0_23], %48 {strides = array<i32>} : memref<8x128xf32, #tpu.memory_space<vmem>>, vector<8x128xf32>,
    } else {
    }
    return
  }
  func.func @transform_0(%arg0: i32) -> (i32, i32, i32) {
    %c0_i32 = arith.constant 0 : i32
    %c0_i32_0 = arith.constant 0 : i32
    %c0_i32_1 = arith.constant 0 : i32
    return %c0_i32, %arg0, %c0_i32_0 : i32, i32, i32
  }
  func.func @transform_1(%arg0: i32) -> (i32, i32) {
    %c0_i32 = arith.constant 0 : i32
    %c0_i32_0 = arith.constant 0 : i32
    %c0_i32_1 = arith.constant 0 : i32
    return %c0_i32, %c0_i32_0 : i32, i32
  }
  func.func @transform_2(%arg0: i32) -> (i32, i32) {
    %c0_i32 = arith.constant 0 : i32
    %c0_i32_0 = arith.constant 0 : i32
    %c0_i32_1 = arith.constant 0 : i32
    return %c0_i32, %c0_i32_0 : i32, i32
  }
  func.func @transform_3(%arg0: i32) -> (i32, i32) {
    %c0_i32 = arith.constant 0 : i32
    %c0_i32_0 = arith.constant 0 : i32
    %c0_i32_1 = arith.constant 0 : i32
    return %c0_i32, %c0_i32_0 : i32, i32
  }
}

</mosaic_0001>

<bundles_post_ra>
// kernel: tpu_custom_call.1
= control target key start
LH: loop header
LB: loop body
LE: loop exit
PB: predicated region body
PF: predicated region fallthrough
CT: control target
= control target key end

     0   :  { %8 = vsyncpa [#allocation5], 0  ;;  %s900_s12 = smov 0   ;;  %s902_s13 = smov 0   ;;  %s1388_s0 = inlined_call_operand.vmem [shape: f32[8,17,384], index: 0, kind: input, shape index: {}]   ;;  %s1389_s1 = inlined_call_operand.vmem [shape: f32[384,128], index: 1, kind: input, shape index: {}]   ;;  %s1390_s2 = inlined_call_operand.vmem [shape: f32[1,128], index: 2, kind: input, shape index: {}]   ;;  %s1391_s3 = inlined_call_operand.hbm [shape: f32[8,128], index: 3, kind: output, shape index: {}]  }
   0x1   :  { %s904_s14 = smov 0  }
   0x2 LB: > { %s916_s15 = sadd.s32 4294967295, %s875_s14   ;;  %s919_s16 = sadd.s32 1, %s875_s14   ;;  %s875_s14 = sphi %s904_s14, %s1396_s14   ;;  %s871_s13 = sphi %s902_s13, %s1395_s13   ;;  %s867_s12 = sphi %s900_s12, %s1394_s12  }
   0x3   : > { %s18_s17 = ssub.s32 %s875_s14, %s919_s16  ;;  %s21_s18 = sadd.s32 1, %s871_s13 }
   0x4   : > { %p19_p0 = scmp.eq.s32.totalorder %s18_s17, 0  ;;  %p28_p1 = scmp.ne.s32.totalorder %s871_s13, %s867_s12 }
   0x5   : > { %p29_p2 = scmp.eq.s32.totalorder %s875_s14, 0  ;;  %p766_p4 = scmp.ge.s32.totalorder %s875_s14, 3 }
   0x6   : > { %s928_s19 = scalar_select %p19_p0, %s871_s13, %s21_s18  }
   0x7   : > { %p30_p3 = por %p29_p2, %p28_p1  ;;  %123 = sbr.rel (%p766_p4) target bundleno = 41 (0x29), region = 24 }
   0xc   : > { %126 = sbr.rel (!%p30_p3) target bundleno = 41 (0x29), region = 28  ;;  %s128_s20 = sand.u32 (%p30_p3), 1, %s871_s13  }
   0xd   : > { %s777_s21 = smul.u32 (%p30_p3), 24, %s875_s14 }
   0xe   : > { %s776_s22 = smul.u32 (%p30_p3), 192, %s128_s20 }
   0xf   : > { %s936_s25 = scalar_lea.vmem (%p30_p3), %s1388_s0, %s777_s21 }
  0x10   : > { %v146_v0 = vld [vmem:[%s936_s25] sm:$0xff] (%p30_p3)  ;;  %v148_v1 = vld [vmem:[%s936_s25 + $0x8] sm:$0xff] (%p30_p3)  ;;  %v150_v2 = vld [vmem:[%s936_s25 + $0x10] sm:$0xff] (%p30_p3)  ;;  %s941_s26 = scalar_lea.vmem (%p30_p3), [#allocation3], %s776_s22 }
  0x11   : > { %147 = vst [vmem:[%s941_s26] sm:$0xff] %v146_v0  ;;  %v152_v3 = vld [vmem:[%s936_s25 + $0x48] sm:$0xff]  ;;  %v154_v4 = vld [vmem:[%s936_s25 + $0x50] sm:$0xff]  ;;  %v156_v5 = vld [vmem:[%s936_s25 + $0x58] sm:$0xff] }
  0x12   : > { %149 = vst [vmem:[%s941_s26 + $0x8] sm:$0xff] %v148_v1  ;;  %v158_v6 = vld [vmem:[%s936_s25 + $0x90] sm:$0xff]  ;;  %v160_v7 = vld [vmem:[%s936_s25 + $0x98] sm:$0xff]  ;;  %v162_v8 = vld [vmem:[%s936_s25 + $0xa0] sm:$0xff] }
  0x13   : > { %151 = vst [vmem:[%s941_s26 + $0x10] sm:$0xff] %v150_v2  ;;  %v164_v9 = vld [vmem:[%s936_s25 + $0xd8] sm:$0xff]  ;;  %v166_v10 = vld [vmem:[%s936_s25 + $0xe0] sm:$0xff]  ;;  %v168_v11 = vld [vmem:[%s936_s25 + $0xe8] sm:$0xff] }
  0x14   : > { %153 = vst [vmem:[%s941_s26 + $0x18] sm:$0xff] %v152_v3  ;;  %v170_v12 = vld [vmem:[%s936_s25 + $0x120] sm:$0xff]  ;;  %v172_v13 = vld [vmem:[%s936_s25 + $0x128] sm:$0xff]  ;;  %v174_v14 = vld [vmem:[%s936_s25 + $0x130] sm:$0xff] }
  0x15   : > { %155 = vst [vmem:[%s941_s26 + $0x20] sm:$0xff] %v154_v4  ;;  %v176_v15 = vld [vmem:[%s936_s25 + $0x168] sm:$0xff]  ;;  %v178_v16 = vld [vmem:[%s936_s25 + $0x170] sm:$0xff]  ;;  %v180_v17 = vld [vmem:[%s936_s25 + $0x178] sm:$0xff] }
  0x16   : > { %157 = vst [vmem:[%s941_s26 + $0x28] sm:$0xff] %v156_v5  ;;  %v182_v18 = vld [vmem:[%s936_s25 + $0x1b0] sm:$0xff]  ;;  %v184_v19 = vld [vmem:[%s936_s25 + $0x1b8] sm:$0xff]  ;;  %v186_v20 = vld [vmem:[%s936_s25 + $0x1c0] sm:$0xff] }
  0x17   : > { %159 = vst [vmem:[%s941_s26 + $0x30] sm:$0xff] %v158_v6  ;;  %v188_v21 = vld [vmem:[%s936_s25 + $0x1f8] sm:$0xff]  ;;  %v190_v22 = vld [vmem:[%s936_s25 + $0x200] sm:$0xff]  ;;  %v192_v23 = vld [vmem:[%s936_s25 + $0x208] sm:$0xff] }
  0x18   : > { %161 = vst [vmem:[%s941_s26 + $0x38] sm:$0xff] %v160_v7 }
  0x19   : > { %163 = vst [vmem:[%s941_s26 + $0x40] sm:$0xff] %v162_v8 }
  0x1a   : > { %165 = vst [vmem:[%s941_s26 + $0x48] sm:$0xff] %v164_v9 }
  0x1b   : > { %167 = vst [vmem:[%s941_s26 + $0x50] sm:$0xff] %v166_v10 }
  0x1c   : > { %169 = vst [vmem:[%s941_s26 + $0x58] sm:$0xff] %v168_v11 }
  0x1d   : > { %171 = vst [vmem:[%s941_s26 + $0x60] sm:$0xff] %v170_v12 }
  0x1e   : > { %173 = vst [vmem:[%s941_s26 + $0x68] sm:$0xff] %v172_v13 }
  0x1f   : > { %175 = vst [vmem:[%s941_s26 + $0x70] sm:$0xff] %v174_v14 }
  0x20   : > { %177 = vst [vmem:[%s941_s26 + $0x78] sm:$0xff] %v176_v15 }
  0x21   : > { %179 = vst [vmem:[%s941_s26 + $0x80] sm:$0xff] %v178_v16 }
  0x22   : > { %181 = vst [vmem:[%s941_s26 + $0x88] sm:$0xff] %v180_v17 }
  0x23   : > { %183 = vst [vmem:[%s941_s26 + $0x90] sm:$0xff] %v182_v18 }
  0x24   : > { %185 = vst [vmem:[%s941_s26 + $0x98] sm:$0xff] %v184_v19 }
  0x25   : > { %187 = vst [vmem:[%s941_s26 + $0xa0] sm:$0xff] %v186_v20 }
  0x26   : > { %189 = vst [vmem:[%s941_s26 + $0xa8] sm:$0xff] %v188_v21 }
  0x27   : > { %191 = vst [vmem:[%s941_s26 + $0xb0] sm:$0xff] %v190_v22 }
  0x28   : > { %193 = vst [vmem:[%s941_s26 + $0xb8] sm:$0xff] %v192_v23 }
  0x29 PF: > { %p768_p5 = scmp.ge.s32.totalorder %s875_s14, 1  ;;  %p198_p6 = scmp.lt.s32.totalorder %s875_s14, 4 }
  0x2b   : > { %p199_p7 = pnand %p768_p5, %p198_p6 }
  0x2c   : > { %s205_s27 = sand.u32 (!%p199_p7), 1, %s867_s12   ;;  %p769_p8 = scmp.ne.s32.totalorder (!%p199_p7), %s916_s15, 0 }
  0x2d   : > { %202 = sbr.rel (%p199_p7) target bundleno = 327 (0x147), region = 51 }
  0x2e   : > { %s778_s28 = smul.u32 (!%p199_p7), 192, %s205_s27 }
  0x30   : > { %s991_s29 = scalar_lea.vmem (!%p199_p7), [#allocation3], %s778_s28 }
  0x32   : > { %226 = sbr.rel (%p769_p8) target bundleno = 59 (0x3b), region = 59 }
  0x37   : > { %v877_v24 = vmov 0.0  }
  0x38   : > { %227 = vst [vmem:[#allocation2 + $0x10] sm:$0xff] %v877_v24 }
  0x39   : > { %228 = vst [vmem:[#allocation2] sm:$0xff] %v877_v24 }
  0x3a   : > { %229 = vst [vmem:[#allocation2 + $0x8] sm:$0xff] %v877_v24 }
  0x3b PF: > { %s770_s30 = sshll.u32 %s916_s15, 3  ;;  %v231_v25 = vlaneseq  ;;  %v238_v28 = vld [vmem:[%s991_s29] sm:$0xff]  ;;  %v239_v30 = vld [vmem:[%s991_s29 + $0x8] sm:$0xff]  ;;  %v240_v31 = vld [vmem:[%s991_s29 + $0x10] sm:$0xff]  ;;  %vm459_vm3 = vcmask 1041409   ;;  %vm461_vm4 = vcmask 1042434  }
  0x3c   : > { %v233_v26 = vstv %s770_s30  ;;  %v241_v32 = vld [vmem:[%s991_s29 + $0x18] sm:$0xff]  ;;  %v242_v33 = vld [vmem:[%s991_s29 + $0x20] sm:$0xff]  ;;  %v243_v34 = vld [vmem:[%s991_s29 + $0x28] sm:$0xff]  ;;  %vm463_vm5 = vcmask 1043459   ;;  %vm465_vm6 = vcmask 1044484   ;;  %vm467_vm7 = vcmask 1045509  }
  0x3d   : > { %v232_v27 = vshrl.u32 %v231_v25, 7  ;;  %v244_v35 = vld [vmem:[%s991_s29 + $0x30] sm:$0xff]  ;;  %v245_v36 = vld [vmem:[%s991_s29 + $0x38] sm:$0xff]  ;;  %v246_v37 = vld [vmem:[%s991_s29 + $0x40] sm:$0xff]  ;;  %vm469_vm8 = vcmask 1046534   ;;  %vm471_vm9 = vcmask 1047559  }
  0x3e   : > { %v247_v38 = vld [vmem:[%s991_s29 + $0x48] sm:$0xff]  ;;  %v248_v39 = vld [vmem:[%s991_s29 + $0x50] sm:$0xff]  ;;  %v249_v40 = vld [vmem:[%s991_s29 + $0x58] sm:$0xff]  ;;  %p771_p9 = scmp.ne.s32.totalorder %s916_s15, 2 }
  0x3f   : > { %v234_v29 = vadd.s32 %v233_v26, %v232_v27  ;;  %v250_v42 = vld [vmem:[%s991_s29 + $0x60] sm:$0xff]  ;;  %v251_v43 = vld [vmem:[%s991_s29 + $0x68] sm:$0xff]  ;;  %v252_v44 = vld [vmem:[%s991_s29 + $0x70] sm:$0xff] }
  0x40   : > { %v253_v45 = vld [vmem:[%s991_s29 + $0x78] sm:$0xff]  ;;  %v254_v46 = vld [vmem:[%s991_s29 + $0x80] sm:$0xff]  ;;  %v255_v48 = vld [vmem:[%s991_s29 + $0x88] sm:$0xff] }
  0x41   : > { %vm235_vm0 = vcmp.ge.s32.totalorder %v234_v29, 1  ;;  %vm236_vm1 = vcmp.lt.s32.totalorder %v234_v29, 17  ;;  %v256_v49 = vld [vmem:[%s991_s29 + $0x90] sm:$0xff]  ;;  %v257_v54 = vld [vmem:[%s991_s29 + $0x98] sm:$0xff]  ;;  %v258_v55 = vld [vmem:[%s991_s29 + $0xa0] sm:$0xff] }
  0x42   : > { %vm1007_vm2 = vmand %vm235_vm0, %vm236_vm1 }
  0x43   : > { %v264_v47 = vsel %vm1007_vm2, %v238_v28, 0.0  ;;  %v265_v50 = vsel %vm1007_vm2, %v239_v30, 0.0  ;;  %v266_v51 = vsel %vm1007_vm2, %v240_v31, 0.0  ;;  %v267_v52 = vsel %vm1007_vm2, %v241_v32, 0.0  ;;  %v259_v32 = vld [vmem:[%s991_s29 + $0xa8] sm:$0xff] }
  0x44   : > { %v268_v53 = vsel %vm1007_vm2, %v242_v33, 0.0  ;;  %v269_v56 = vsel %vm1007_vm2, %v243_v34, 0.0  ;;  %v270_v57 = vsel %vm1007_vm2, %v244_v35, 0.0  ;;  %v271_v58 = vsel %vm1007_vm2, %v245_v36, 0.0  ;;  %v260_v33 = vld [vmem:[%s991_s29 + $0xb0] sm:$0xff]  ;;  %v261_v34 = vld [vmem:[%s991_s29 + $0xb8] sm:$0xff] }
  0x45   : > { %v1038_v59 = vsel %vm1007_vm2, %v246_v37, 0.0  ;;  %v1042_v60 = vsel %vm1007_vm2, %v247_v38, 0.0  ;;  %v1046_v61 = vsel %vm1007_vm2, %v248_v39, 0.0  ;;  %v1050_v62 = vsel %vm1007_vm2, %v249_v40, 0.0 }
  0x46   : > { %v1054_v63 = vsel %vm1007_vm2, %v250_v42, 0.0  ;;  %v1058_v0 = vsel %vm1007_vm2, %v251_v43, 0.0  ;;  %v1062_v1 = vsel %vm1007_vm2, %v252_v44, 0.0  ;;  %v1066_v2 = vsel %vm1007_vm2, %v253_v45, 0.0 }
  0x47   : > { %v1070_v3 = vsel %vm1007_vm2, %v254_v46, 0.0  ;;  %v1074_v4 = vsel %vm1007_vm2, %v255_v48, 0.0  ;;  %v1078_v5 = vsel %vm1007_vm2, %v256_v49, 0.0  ;;  %v1082_v6 = vsel %vm1007_vm2, %v257_v54, 0.0 }
  0x48   : > { %v1086_v7 = vsel %vm1007_vm2, %v258_v55, 0.0  ;;  %v291_v8 = vrot.slane %v264_v47, 4  ;;  %v297_v9 = vrot.slane %v265_v50, 4  ;;  %v303_v10 = vrot.slane %v266_v51, 4 }
  0x49   : > { %v309_v11 = vrot.slane %v267_v52, 4  ;;  %v315_v12 = vrot.slane %v268_v53, 4  ;;  %v321_v13 = vrot.slane %v269_v56, 4  ;;  %v327_v14 = vrot.slane %v270_v57, 4 }
  0x4a   : > { %v333_v15 = vrot.slane %v271_v58, 4  ;;  %v292_v16 = vadd.f32 %v291_v8, %v264_v47  ;;  %v298_v17 = vadd.f32 %v297_v9, %v265_v50  ;;  %v304_v18 = vadd.f32 %v303_v10, %v266_v51 }
  0x4b   : > { %v310_v19 = vadd.f32 %v309_v11, %v267_v52  ;;  %v316_v20 = vadd.f32 %v315_v12, %v268_v53  ;;  %v322_v21 = vadd.f32 %v321_v13, %v269_v56  ;;  %v328_v22 = vadd.f32 %v327_v14, %v270_v57 }
  0x4c   : > { %v334_v23 = vadd.f32 %v333_v15, %v271_v58  ;;  %v293_v24 = vrot.slane %v292_v16, 2  ;;  %v299_v25 = vrot.slane %v298_v17, 2  ;;  %v305_v26 = vrot.slane %v304_v18, 2 }
  0x4d   : > { %v311_v27 = vrot.slane %v310_v19, 2  ;;  %v317_v28 = vrot.slane %v316_v20, 2  ;;  %v323_v29 = vrot.slane %v322_v21, 2  ;;  %v329_v30 = vrot.slane %v328_v22, 2 }
  0x4e   : > { %v335_v31 = vrot.slane %v334_v23, 2  ;;  %v294_v35 = vadd.f32 %v293_v24, %v292_v16  ;;  %v300_v36 = vadd.f32 %v299_v25, %v298_v17  ;;  %v306_v37 = vadd.f32 %v305_v26, %v304_v18 }
  0x4f   : > { %v312_v38 = vadd.f32 %v311_v27, %v310_v19  ;;  %v318_v39 = vadd.f32 %v317_v28, %v316_v20  ;;  %v324_v40 = vadd.f32 %v323_v29, %v322_v21  ;;  %v330_v42 = vadd.f32 %v329_v30, %v328_v22 }
  0x50   : > { %v336_v43 = vadd.f32 %v335_v31, %v334_v23  ;;  %v295_v44 = vrot.slane %v294_v35, 1  ;;  %v301_v45 = vrot.slane %v300_v36, 1  ;;  %v307_v46 = vrot.slane %v306_v37, 1 }
  0x51   : > { %v313_v47 = vrot.slane %v312_v38, 1  ;;  %v1093_v48 = vsel %vm1007_vm2, %v259_v32, 0.0  ;;  %v1097_v49 = vsel %vm1007_vm2, %v260_v33, 0.0  ;;  %v1101_v50 = vsel %vm1007_vm2, %v261_v34, 0.0 }
  0x52   : > { %v319_v51 = vrot.slane %v318_v39, 1  ;;  %v1103_v52 = vadd.f32 %v295_v44, %v294_v35  ;;  %v325_v53 = vrot.slane %v324_v40, 1  ;;  %v331_v54 = vrot.slane %v330_v42, 1 }
  0x53   : > { %v337_v55 = vrot.slane %v336_v43, 1  ;;  %v1105_v56 = vadd.f32 %v301_v45, %v300_v36  ;;  %v1107_v57 = vadd.f32 %v307_v46, %v306_v37  ;;  %v1109_v58 = vadd.f32 %v313_v47, %v312_v38 }
  0x54   : > { %v1111_v8 = vadd.f32 %v319_v51, %v318_v39  ;;  %v339_v9 = vrot.slane %v1038_v59, 4  ;;  %v345_v41 = vrot.slane %v1042_v60, 4  ;;  %v351_v10 = vrot.slane %v1046_v61, 4 }
  0x55   : > { %v357_v11 = vrot.slane %v1050_v62, 4  ;;  %v363_v12 = vrot.slane %v1054_v63, 4  ;;  %v369_v13 = vrot.slane %v1058_v0, 4  ;;  %v375_v14 = vrot.slane %v1062_v1, 4 }
  0x56   : > { %v381_v15 = vrot.slane %v1066_v2, 4  ;;  %v340_v16 = vadd.f32 %v339_v9, %v1038_v59  ;;  %v346_v17 = vadd.f32 %v345_v41, %v1042_v60  ;;  %v352_v18 = vadd.f32 %v351_v10, %v1046_v61 }
  0x57   : > { %v358_v19 = vadd.f32 %v357_v11, %v1050_v62  ;;  %v364_v20 = vadd.f32 %v363_v12, %v1054_v63  ;;  %v370_v21 = vadd.f32 %v369_v13, %v1058_v0  ;;  %v376_v22 = vadd.f32 %v375_v14, %v1062_v1 }
  0x58   : > { %v382_v23 = vadd.f32 %v381_v15, %v1066_v2  ;;  %v341_v24 = vrot.slane %v340_v16, 2  ;;  %v347_v25 = vrot.slane %v346_v17, 2  ;;  %v353_v26 = vrot.slane %v352_v18, 2 }
  0x59   : > { %v359_v27 = vrot.slane %v358_v19, 2  ;;  %v365_v28 = vrot.slane %v364_v20, 2  ;;  %v371_v59 = vrot.slane %v370_v21, 2  ;;  %v377_v29 = vrot.slane %v376_v22, 2 }
  0x5a   : > { %v383_v60 = vrot.slane %v382_v23, 2  ;;  %v342_v30 = vadd.f32 %v341_v24, %v340_v16  ;;  %v348_v61 = vadd.f32 %v347_v25, %v346_v17  ;;  %v354_v31 = vadd.f32 %v353_v26, %v352_v18 }
  0x5b   : > { %v360_v62 = vadd.f32 %v359_v27, %v358_v19  ;;  %v366_v32 = vadd.f32 %v365_v28, %v364_v20  ;;  %v372_v63 = vadd.f32 %v371_v59, %v370_v21  ;;  %v378_v33 = vadd.f32 %v377_v29, %v376_v22 }
  0x5c   : > { %v384_v0 = vadd.f32 %v383_v60, %v382_v23  ;;  %v343_v34 = vrot.slane %v342_v30, 1  ;;  %v349_v1 = vrot.slane %v348_v61, 1  ;;  %v355_v35 = vrot.slane %v354_v31, 1 }
  0x5d   : > { %v361_v2 = vrot.slane %v360_v62, 1  ;;  %v1129_v36 = vadd.f32 %v325_v53, %v324_v40  ;;  %v1131_v37 = vadd.f32 %v331_v54, %v330_v42  ;;  %v1133_v38 = vadd.f32 %v337_v55, %v336_v43 }
  0x5e   : > { %v367_v39 = vrot.slane %v366_v32, 1  ;;  %v1135_v44 = vadd.f32 %v343_v34, %v342_v30  ;;  %v373_v45 = vrot.slane %v372_v63, 1  ;;  %v379_v46 = vrot.slane %v378_v33, 1 }
  0x5f   : > { %v385_v47 = vrot.slane %v384_v0, 1  ;;  %v1137_v51 = vadd.f32 %v349_v1, %v348_v61  ;;  %v1139_v9 = vadd.f32 %v355_v35, %v354_v31  ;;  %v1141_v41 = vadd.f32 %v361_v2, %v360_v62 }
  0x60   : > { %v1143_v10 = vadd.f32 %v367_v39, %v366_v32  ;;  %v387_v40 = vrot.slane %v1070_v3, 4  ;;  %v393_v42 = vrot.slane %v1074_v4, 4  ;;  %v399_v43 = vrot.slane %v1078_v5, 4 }
  0x61   : > { %v405_v53 = vrot.slane %v1082_v6, 4  ;;  %v411_v54 = vrot.slane %v1086_v7, 4  ;;  %v417_v55 = vrot.slane %v1093_v48, 4  ;;  %v423_v11 = vrot.slane %v1097_v49, 4 }
  0x62   : > { %v429_v12 = vrot.slane %v1101_v50, 4  ;;  %v388_v13 = vadd.f32 %v387_v40, %v1070_v3  ;;  %v394_v14 = vadd.f32 %v393_v42, %v1074_v4  ;;  %v400_v15 = vadd.f32 %v399_v43, %v1078_v5 }
  0x63   : > { %v406_v16 = vadd.f32 %v405_v53, %v1082_v6  ;;  %v412_v17 = vadd.f32 %v411_v54, %v1086_v7  ;;  %v418_v18 = vadd.f32 %v417_v55, %v1093_v48  ;;  %v424_v19 = vadd.f32 %v423_v11, %v1097_v49 }
  0x64   : > { %v430_v20 = vadd.f32 %v429_v12, %v1101_v50  ;;  %v389_v21 = vrot.slane %v388_v13, 2  ;;  %v395_v22 = vrot.slane %v394_v14, 2  ;;  %v401_v23 = vrot.slane %v400_v15, 2 }
  0x65   : > { %v407_v24 = vrot.slane %v406_v16, 2  ;;  %v413_v25 = vrot.slane %v412_v17, 2  ;;  %v419_v3 = vrot.slane %v418_v18, 2  ;;  %v425_v26 = vrot.slane %v424_v19, 2 }
  0x66   : > { %v431_v4 = vrot.slane %v430_v20, 2  ;;  %v390_v27 = vadd.f32 %v389_v21, %v388_v13  ;;  %v396_v5 = vadd.f32 %v395_v22, %v394_v14  ;;  %v402_v28 = vadd.f32 %v401_v23, %v400_v15 }
  0x67   : > { %v408_v6 = vadd.f32 %v407_v24, %v406_v16  ;;  %v414_v59 = vadd.f32 %v413_v25, %v412_v17  ;;  %v420_v7 = vadd.f32 %v419_v3, %v418_v18  ;;  %v426_v29 = vadd.f32 %v425_v26, %v424_v19 }
  0x68   : > { %v432_v48 = vadd.f32 %v431_v4, %v430_v20  ;;  %v391_v60 = vrot.slane %v390_v27, 1  ;;  %v397_v49 = vrot.slane %v396_v5, 1  ;;  %v403_v30 = vrot.slane %v402_v28, 1 }
  0x69   : > { %v409_v50 = vrot.slane %v408_v6, 1  ;;  %v415_v61 = vrot.slane %v414_v59, 1  ;;  %v421_v31 = vrot.slane %v420_v7, 1  ;;  %v427_v62 = vrot.slane %v426_v29, 1 }
  0x6a   : > { %v433_v32 = vrot.slane %v432_v48, 1  ;;  %v374_v34 = vadd.f32 %v373_v45, %v372_v63  ;;  %v380_v1 = vadd.f32 %v379_v46, %v378_v33  ;;  %v386_v35 = vadd.f32 %v385_v47, %v384_v0  ;;  %v290_v47 = vld [vmem:[#allocation2 + $0x8] sm:$0xff] }
  0x6b   : > { %v392_v2 = vadd.f32 %v391_v60, %v390_v27  ;;  %v398_v39 = vadd.f32 %v397_v49, %v396_v5  ;;  %v404_v40 = vadd.f32 %v403_v30, %v402_v28  ;;  %v410_v42 = vadd.f32 %v409_v50, %v408_v6 }
  0x6c   : > { %v416_v43 = vadd.f32 %v415_v61, %v414_v59  ;;  %v422_v53 = vadd.f32 %v421_v31, %v420_v7  ;;  %v428_v54 = vadd.f32 %v427_v62, %v426_v29  ;;  %v434_v55 = vadd.f32 %v433_v32, %v432_v48 }
  0x6d   : > { %v460_v11 = vsel %vm459_vm3, %v1109_v58, %v1103_v52  ;;  %v473_v63 = vsel %vm459_vm3, %v1111_v8, %v1105_v56  ;;  %v480_v33 = vsel %vm459_vm3, %v1129_v36, %v1107_v57  ;;  %v288_v8 = vld [vmem:[#allocation2 + $0x10] sm:$0xff] }
  0x6e   : > { %v462_v12 = vsel %vm461_vm4, %v1131_v37, %v460_v11  ;;  %v474_v45 = vsel %vm461_vm4, %v1133_v38, %v473_v63  ;;  %v481_v46 = vsel %vm461_vm4, %v1135_v44, %v480_v33  ;;  %v289_v38 = vld [vmem:[#allocation2] sm:$0xff] }
  0x6f   : > { %v464_v0 = vsel %vm463_vm5, %v1137_v51, %v462_v12  ;;  %v475_v58 = vsel %vm463_vm5, %v1139_v9, %v474_v45  ;;  %v482_v56 = vsel %vm463_vm5, %v1141_v41, %v481_v46 }
  0x70   : > { %v466_v52 = vsel %vm465_vm6, %v1143_v10, %v464_v0  ;;  %v476_v36 = vsel %vm465_vm6, %v374_v34, %v475_v58  ;;  %v483_v37 = vsel %vm465_vm6, %v380_v1, %v482_v56 }
  0x71   : > { %v468_v57 = vsel %vm467_vm7, %v386_v35, %v466_v52  ;;  %v477_v51 = vsel %vm467_vm7, %v392_v2, %v476_v36  ;;  %v484_v10 = vsel %vm467_vm7, %v398_v39, %v483_v37 }
  0x72   : > { %v470_v44 = vsel %vm469_vm8, %v404_v40, %v468_v57  ;;  %v478_v13 = vsel %vm469_vm8, %v410_v42, %v477_v51  ;;  %v485_v41 = vsel %vm469_vm8, %v416_v43, %v484_v10 }
  0x73   : > { %v472_v9 = vsel %vm471_vm9, %v422_v53, %v470_v44  ;;  %v479_v14 = vsel %vm471_vm9, %v428_v54, %v478_v13  ;;  %v486_v15 = vsel %vm471_vm9, %v434_v55, %v485_v41 }
  0x74   : > { %v490_v16 = vadd.f32 %v472_v9, %v288_v8  ;;  %v491_v17 = vadd.f32 %v479_v14, %v289_v38  ;;  %v492_v18 = vadd.f32 %v486_v15, %v290_v47  ;;  %499 = sbr.rel (%p771_p9) target bundleno = 322 (0x142), region = 63 }
  0x76   : > { %493 = vst [vmem:[#allocation2 + $0x10] sm:$0xff] %v490_v16 }
  0x77   : > { %494 = vst [vmem:[#allocation2] sm:$0xff] %v491_v17 }
  0x78   : > { %495 = vst [vmem:[#allocation2 + $0x8] sm:$0xff] %v492_v18 }
  0x79   : > { %v644_v19 = vld [vmem:[%s1389_s1 + $0x178] sm:$0xff]  ;;  %v643_v21 = vld [vmem:[%s1389_s1 + $0x170] sm:$0xff]  ;;  %v642_v24 = vld [vmem:[%s1389_s1 + $0x168] sm:$0xff]  ;;  %v878_v26 = vmov 8.0  }
  0x7a   : > { %v612_v20 = vld [vmem:[%s1389_s1 + $0x78] sm:$0xff]  ;;  %689 = vmatpush.msra.mxu2 %v644_v19  ;;  %v611_v22 = vld [vmem:[%s1389_s1 + $0x70] sm:$0xff]  ;;  %v610_v25 = vld [vmem:[%s1389_s1 + $0x68] sm:$0xff]  ;;  %813 = vrcp.f32 %v878_v26 }
  0x7b   : > { %649 = vmatpush.msra.mxu0 %v612_v20  ;;  %v628_v23 = vld [vmem:[%s1389_s1 + $0xf8] sm:$0xff]  ;;  %v627_v3 = vld [vmem:[%s1389_s1 + $0xf0] sm:$0xff]  ;;  %v626_v4 = vld [vmem:[%s1389_s1 + $0xe8] sm:$0xff] }
  0x7c   : > { %669 = vmatpush.msra.mxu1 %v628_v23  ;;  %690 = vmatpush.msra.mxu2 %v643_v21  ;;  %v641_v27 = vld [vmem:[%s1389_s1 + $0x160] sm:$0xff]  ;;  %v640_v6 = vld [vmem:[%s1389_s1 + $0x158] sm:$0xff]  ;;  %v639_v48 = vld [vmem:[%s1389_s1 + $0x150] sm:$0xff] }
  0x7d   : > { %650 = vmatpush.msra.mxu0 %v611_v22  ;;  %v609_v5 = vld [vmem:[%s1389_s1 + $0x60] sm:$0xff]  ;;  %v608_v59 = vld [vmem:[%s1389_s1 + $0x58] sm:$0xff]  ;;  %v607_v60 = vld [vmem:[%s1389_s1 + $0x50] sm:$0xff] }
  0x7e   : > { %670 = vmatpush.msra.mxu1 %v627_v3  ;;  %691 = vmatpush.msra.mxu2 %v642_v24  ;;  %v625_v28 = vld [vmem:[%s1389_s1 + $0xe0] sm:$0xff]  ;;  %v624_v7 = vld [vmem:[%s1389_s1 + $0xd8] sm:$0xff]  ;;  %v623_v49 = vld [vmem:[%s1389_s1 + $0xd0] sm:$0xff] }
  0x7f   : > { %651 = vmatpush.msra.mxu0 %v610_v25  ;;  %v638_v30 = vld [vmem:[%s1389_s1 + $0x148] sm:$0xff]  ;;  %v637_v62 = vld [vmem:[%s1389_s1 + $0x140] sm:$0xff]  ;;  %v636_v34 = vld [vmem:[%s1389_s1 + $0x138] sm:$0xff] }
  0x80   : > { %671 = vmatpush.msra.mxu1 %v626_v4  ;;  %692 = vmatpush.msra.mxu2 %v641_v27  ;;  %v1235_v29 = vpop.eup %813  ;;  %v606_v50 = vld [vmem:[%s1389_s1 + $0x48] sm:$0xff]  ;;  %v605_v32 = vld [vmem:[%s1389_s1 + $0x40] sm:$0xff]  ;;  %v604_v35 = vld [vmem:[%s1389_s1 + $0x38] sm:$0xff] }
  0x81   : > { %652 = vmatpush.msra.mxu0 %v609_v5  ;;  %v622_v61 = vld [vmem:[%s1389_s1 + $0xc8] sm:$0xff]  ;;  %v525_v31 = vmul.f32 8.0, %v1235_v29  ;;  %v621_v1 = vld [vmem:[%s1389_s1 + $0xc0] sm:$0xff]  ;;  %v635_v2 = vld [vmem:[%s1389_s1 + $0x130] sm:$0xff]  ;;  %vm529_vm10 = vweird.f32 %v1235_v29 }
  0x82   : > { %672 = vmatpush.msra.mxu1 %v625_v28  ;;  %693 = vmatpush.msra.mxu2 %v640_v6  ;;  %v620_v39 = vld [vmem:[%s1389_s1 + $0xb8] sm:$0xff]  ;;  %v502_v40 = vld [vmem:[#allocation2 + $0x8] sm:$0xff]  ;;  %v500_v43 = vld [vmem:[#allocation2 + $0x10] sm:$0xff] }
  0x83   : > { %653 = vmatpush.msra.mxu0 %v608_v59  ;;  %v526_v42 = vsub.f32 1.0, %v525_v31  ;;  %v501_v53 = vld [vmem:[#allocation2] sm:$0xff]  ;;  %v603_v54 = vld [vmem:[%s1389_s1 + $0x30] sm:$0xff]  ;;  %v1280_v55 = vmul.f32 0.0625, %v502_v40  ;;  %v1282_v11 = vmul.f32 0.0625, %v500_v43  ;;  %v634_v33 = vld [vmem:[%s1389_s1 + $0x128] sm:$0xff] }
  0x84   : > { %673 = vmatpush.msra.mxu1 %v624_v7  ;;  %694 = vmatpush.msra.mxu2 %v639_v48  ;;  %v1284_v12 = vmul.f32 0.0625, %v501_v53  ;;  %v619_v63 = vld [vmem:[%s1389_s1 + $0xb0] sm:$0xff]  ;;  %v602_v0 = vld [vmem:[%s1389_s1 + $0x28] sm:$0xff]  ;;  %v633_v8 = vld [vmem:[%s1389_s1 + $0x120] sm:$0xff] }
  0x85   : > { %654 = vmatpush.msra.mxu0 %v607_v60  ;;  %v518_v45 = vrot.slane %v1280_v55, 4  ;;  %v506_v46 = vrot.slane %v1282_v11, 4  ;;  %v618_v58 = vld [vmem:[%s1389_s1 + $0xa8] sm:$0xff]  ;;  %v527_v56 = vmul.f32 %v1235_v29, %v526_v42  ;;  %v601_v57 = vld [vmem:[%s1389_s1 + $0x20] sm:$0xff]  ;;  %v632_v44 = vld [vmem:[%s1389_s1 + $0x118] sm:$0xff] }
  0x86   : > { %674 = vmatpush.msra.mxu1 %v623_v49  ;;  %695 = vmatpush.msra.mxu2 %v638_v30  ;;  %v512_v52 = vrot.slane %v1284_v12, 4  ;;  %v617_v47 = vld [vmem:[%s1389_s1 + $0xa0] sm:$0xff]  ;;  %v600_v51 = vld [vmem:[%s1389_s1 + $0x18] sm:$0xff]  ;;  %v631_v15 = vld [vmem:[%s1389_s1 + $0x110] sm:$0xff] }
  0x87   : > { %655 = vmatpush.msra.mxu0 %v606_v50  ;;  %v519_v36 = vadd.f32 %v518_v45, %v1280_v55  ;;  %v507_v37 = vadd.f32 %v506_v46, %v1282_v11  ;;  %v616_v41 = vld [vmem:[%s1389_s1 + $0x98] sm:$0xff]  ;;  %v528_v14 = vadd.f32 %v1235_v29, %v527_v56  ;;  %v599_v16 = vld [vmem:[%s1389_s1 + $0x10] sm:$0xff]  ;;  %v630_v21 = vld [vmem:[%s1389_s1 + $0x108] sm:$0xff] }
  0x88   : > { %675 = vmatpush.msra.mxu1 %v622_v61  ;;  %696 = vmatpush.msra.mxu2 %v637_v62  ;;  %v513_v38 = vadd.f32 %v512_v52, %v1284_v12  ;;  %v615_v20 = vld [vmem:[%s1389_s1 + $0x90] sm:$0xff]  ;;  %v598_v22 = vld [vmem:[%s1389_s1 + $0x8] sm:$0xff]  ;;  %v629_v26 = vld [vmem:[%s1389_s1 + $0x100] sm:$0xff] }
  0x89   : > { %656 = vmatpush.msra.mxu0 %v605_v32  ;;  %v520_v10 = vrot.slane %v519_v36, 2  ;;  %v508_v9 = vrot.slane %v507_v37, 2  ;;  %v530_v3 = vsel %vm529_vm10, %v1235_v29, %v528_v14  ;;  %v613_v42 = vld [vmem:[%s1389_s1 + $0x80] sm:$0xff] }
  0x8a   : > { %676 = vmatpush.msra.mxu1 %v621_v1  ;;  %697 = vmatpush.msra.mxu2 %v636_v34  ;;  %v514_v13 = vrot.slane %v513_v38, 2 }
  0x8b   : > { %657 = vmatpush.msra.mxu0 %v604_v35  ;;  %v521_v17 = vadd.f32 %v520_v10, %v519_v36  ;;  %v509_v18 = vadd.f32 %v508_v9, %v507_v37  ;;  %v597_v35 = vld [vmem:[%s1389_s1] sm:$0xff] }
  0x8c   : > { %677 = vmatpush.msra.mxu1 %v620_v39  ;;  %698 = vmatpush.msra.mxu2 %v635_v2  ;;  %v515_v19 = vadd.f32 %v514_v13, %v513_v38  ;;  %v614_v2 = vld [vmem:[%s1389_s1 + $0x88] sm:$0xff] }
  0x8d   : > { %658 = vmatpush.msra.mxu0 %v603_v54  ;;  %v522_v23 = vrot.slane %v521_v17, 1  ;;  %v510_v24 = vrot.slane %v509_v18, 1 }
  0x8e   : > { %678 = vmatpush.msra.mxu1 %v619_v63  ;;  %699 = vmatpush.msra.mxu2 %v634_v33  ;;  %v516_v25 = vrot.slane %v515_v19, 1 }
  0x8f   : > { %659 = vmatpush.msra.mxu0 %v602_v0  ;;  %v523_v4 = vadd.f32 %v522_v23, %v521_v17  ;;  %v511_v27 = vadd.f32 %v510_v24, %v509_v18 }
  0x90   : > { %679 = vmatpush.msra.mxu1 %v618_v58  ;;  %700 = vmatpush.msra.mxu2 %v633_v8  ;;  %v517_v5 = vadd.f32 %v516_v25, %v515_v19 }
  0x91   : > { %660 = vmatpush.msra.mxu0 %v601_v57  ;;  %v533_v28 = vmul.f32 %v530_v3, %v523_v4  ;;  %v531_v6 = vmul.f32 %v530_v3, %v511_v27 }
  0x92   : > { %680 = vmatpush.msra.mxu1 %v617_v47  ;;  %701 = vmatpush.msra.mxu2 %v632_v44  ;;  %v532_v59 = vmul.f32 %v530_v3, %v517_v5 }
  0x93   : > { %661 = vmatpush.msra.mxu0 %v600_v51  ;;  %v1345_v7 = vsub.f32 %v1280_v55, %v533_v28  ;;  %v1348_v48 = vsub.f32 %v1282_v11, %v531_v6 }
  0x94   : > { %681 = vmatpush.msra.mxu1 %v616_v41  ;;  %702 = vmatpush.msra.mxu2 %v631_v15  ;;  %v1351_v29 = vsub.f32 %v1284_v12, %v532_v59 }
  0x95   : > { %662 = vmatpush.msra.mxu0 %v599_v16  ;;  %v539_v60 = vmul.f32 %v1345_v7, %v1345_v7  ;;  %v537_v49 = vmul.f32 %v1348_v48, %v1348_v48 }
  0x96   : > { %682 = vmatpush.msra.mxu1 %v615_v20  ;;  %703 = vmatpush.msra.mxu2 %v630_v21  ;;  %v538_v30 = vmul.f32 %v1351_v29, %v1351_v29 }
  0x97   : > { %663 = vmatpush.msra.mxu0 %v598_v22  ;;  %v552_v50 = vrot.slane %v539_v60, 4  ;;  %v540_v61 = vrot.slane %v537_v49, 4 }
  0x98   : > { %704 = vmatpush.msra.mxu2 %v629_v26  ;;  %v546_v31 = vrot.slane %v538_v30, 4  ;;  %683 = vmatpush.msra.mxu1 %v614_v2  ;;  %v812_v26 = vld [vmem:[%s1390_s2] ss:$0 sm:$0xff] }
  0x99   : > { %v553_v62 = vadd.f32 %v552_v50, %v539_v60  ;;  %v541_v32 = vadd.f32 %v540_v61, %v537_v49  ;;  %664 = vmatpush.msra.mxu0 %v597_v35 }
  0x9a   : > { %v547_v34 = vadd.f32 %v546_v31, %v538_v30  ;;  %684 = vmatpush.msra.mxu1 %v613_v42 }
  0x9b   : > { %v554_v1 = vrot.slane %v553_v62, 2  ;;  %v542_v39 = vrot.slane %v541_v32, 2 }
  0x9c   : > { %v548_v40 = vrot.slane %v547_v34, 2 }
  0x9d   : > { %v555_v43 = vadd.f32 %v554_v1, %v553_v62  ;;  %v543_v53 = vadd.f32 %v542_v39, %v541_v32 }
  0x9e   : > { %v549_v54 = vadd.f32 %v548_v40, %v547_v34 }
  0x9f   : > { %v556_v55 = vrot.slane %v555_v43, 1  ;;  %v544_v11 = vrot.slane %v543_v53, 1 }
  0xa0   : > { %v550_v12 = vrot.slane %v549_v54, 1 }
  0xa1   : > { %v557_v63 = vadd.f32 %v556_v55, %v555_v43  ;;  %v545_v33 = vadd.f32 %v544_v11, %v543_v53 }
  0xa2   : > { %v551_v0 = vadd.f32 %v550_v12, %v549_v54 }
  0xa3   : > { %v560_v45 = vmul.f32 %v557_v63, %v530_v3  ;;  %v558_v46 = vmul.f32 %v545_v33, %v530_v3 }
  0xa4   : > { %v559_v52 = vmul.f32 %v551_v0, %v530_v3 }
  0xa5   : > { %v563_v58 = vadd.f32 1e-06, %v560_v45  ;;  %v561_v56 = vadd.f32 1e-06, %v558_v46 }
  0xa6   : > { %v562_v8 = vadd.f32 1e-06, %v559_v52 }
  0xa7   : > { %815 = vrsqrt.f32 %v563_v58  ;;  %vm590_vm11 = vweird.f32 %v563_v58  ;;  %vm570_vm13 = vweird.f32 %v561_v56 }
  0xa8   : > { %817 = vrsqrt.f32 %v561_v56  ;;  %vm580_vm15 = vweird.f32 %v562_v8 }
  0xa9   : > { %819 = vrsqrt.f32 %v562_v8 }
  0xad   : > { %v816_v57 = vpop.eup %815 }
  0xae   : > { %v818_v36 = vpop.eup %817  ;;  %v585_v37 = vmul.f32 %v816_v57, %v563_v58  ;;  %vm591_vm12 = vweird.f32 %v816_v57 }
  0xaf   : > { %v820_v38 = vpop.eup %819  ;;  %v565_v47 = vmul.f32 %v818_v36, %v561_v56  ;;  %vm571_vm14 = vweird.f32 %v818_v36  ;;  %vm592_vm1 = vmor %vm590_vm11, %vm591_vm12 }
  0xb0   : > { %v586_v44 = vmul.f32 %v816_v57, %v585_v37  ;;  %v575_v51 = vmul.f32 %v820_v38, %v562_v8  ;;  %vm581_vm0 = vweird.f32 %v820_v38  ;;  %vm572_vm2 = vmor %vm570_vm13, %vm571_vm14 }
  0xb1   : > { %v566_v10 = vmul.f32 %v818_v36, %v565_v47  ;;  %vm582_vm3 = vmor %vm580_vm15, %vm581_vm0 }
  0xb2   : > { %v587_v9 = vmul.f32 0.5, %v586_v44  ;;  %v576_v13 = vmul.f32 %v820_v38, %v575_v51 }
  0xb3   : > { %v567_v41 = vmul.f32 0.5, %v566_v10 }
  0xb4   : > { %v588_v14 = vsub.f32 1.5, %v587_v9  ;;  %v577_v15 = vmul.f32 0.5, %v576_v13 }
  0xb5   : > { %v568_v16 = vsub.f32 1.5, %v567_v41 }
  0xb6   : > { %v589_v17 = vmul.f32 %v816_v57, %v588_v14  ;;  %v578_v18 = vsub.f32 1.5, %v577_v15 }
  0xb7   : > { %v569_v19 = vmul.f32 %v818_v36, %v568_v16 }
  0xb8   : > { %v593_v20 = vsel %vm592_vm1, %v816_v57, %v589_v17  ;;  %v579_v21 = vmul.f32 %v820_v38, %v578_v18 }
  0xb9   : > { %v596_v22 = vmul.f32 %v593_v20, %v1345_v7  ;;  %v573_v23 = vsel %vm572_vm2, %v818_v36, %v569_v19 }
  0xba   : > { %v594_v24 = vmul.f32 %v573_v23, %v1348_v48  ;;  %v583_v25 = vsel %vm582_vm3, %v820_v38, %v579_v21 }
  0xbb   : > { %705 = vmatmul.f32.vlgmr.msra.gmra.mxu2 %v596_v22  ;;  %v595_v3 = vmul.f32 %v583_v25, %v1351_v29 }
  0xbc   : > { %665 = vmatmul.f32.vlgmr.msra.gmra.mxu0 %v594_v24 }
  0xbd   : > { %685 = vmatmul.f32.vlgmr.msra.gmra.mxu1 %v595_v3 }
 0x139   : > { %v666_v4 = vpop.f32.mrf.mxu0 }
 0x13a   : > { %v667_v27 = vadd.f32 %v812_v26, %v666_v4  ;;  %v686_v5 = vpop.f32.mrf.mxu1 }
 0x13c   : > { %v687_v28 = vadd.f32 %v686_v5, %v667_v27 }
 0x13e   : > { %v706_v6 = vpop.f32.mrf.mxu2 }
 0x13f   : > { %v707_v59 = vadd.f32 %v706_v6, %v687_v28 }
 0x141   : > { %709 = vst [vmem:[#allocation4] sm:$0xff] %v707_v59 }
 0x142 PF: > { %p783_p10 = scmp.eq.s32.totalorder %s916_s15, 2  ;;  %s879_s10 = smov [#allocation4]  }
 0x143   : > { %s716_s11 = sshll.u32 %s879_s10, 4  ;;  %s718_s17 = sshll.u32 %s1391_s3, 4  ;;  %s717_s11 = int_to_ptr.vmem [resolvable:$true] %s716_s11  ;;  %s719_s17 = int_to_ptr.hbm [resolvable:$true] %s718_s17 }
 0x144   : > { %780 = dma.vmem_to_hbm [thread:$0]  (%p783_p10), %s717_s11, 128, %s719_s17, [#allocation5]  }
 0x145   : > { %862 = dma.done.wait (%p783_p10), [#allocation5], 128  }
 0x146   : > { %864 = vsyncadd (%p783_p10), [#allocation5], 4294967168 }
 0x147 PF: > { %p11_p11 = scmp.ge.s32.totalorder %s919_s16, 5   ;;  %s1394_s12 = smov %s871_s13 }
 0x148   : > { %s1395_s13 = smov %s928_s19  ;;  %s1396_s14 = smov %s919_s16 }
 0x149   :  { %13 = sbr.rel (!%p11_p11) target bundleno = 2 (0x2), region = 95 }
 0x14e   :  { %732 = vsyncpa [#allocation5], 1 }
 0x14f   :  { %734 = vsyncpa [#allocation5 + $0x1], 1 }

</bundles_post_ra>
